<compile_context>
chip_gen: v5e
topology: v5e:2x2
jax: 0.10.0
libtpu: 0.0.40
codegen_flags: <defaults>
</compile_context>

<pallas_src>
import functools

import numpy as np
import jax
import jax.numpy as jnp
from jax import lax
from jax.experimental import pallas as pl
from jax.experimental.pallas import tpu as pltpu


def _nearest_upsample_kernel(x_ref, r_ref, o_ref, *, sh, tw, n_w, w_out,
                             compute_dtype, precision):
    """Upsample one (tr, W) tile of rows into a (tr, sh*w_out) output tile.

    x_ref : (tr, W)         input rows (flattened N*C*H axis), original dtype
    r_ref : (tw, tw*sw)     constant 0/1 column-replication block  R[u, v] = (u == v // sw)
    o_ref : (tr, sh*w_out)  output rows; the sh row-replicas of an input row are the
                            sh contiguous length-w_out chunks of one output row
                            (free row-major view of (rows*sh, W*sw)).

    Column replication: y_j = x_j @ R per W-chunk j (block-diagonal structure).
    Row replication:    `sh` plain lane-slice stores of y_j (no L matmul).
    Each output element is exactly 1*x + sum-of-zeros, so values are copied exactly
    (bf16 natively on the MXU; f32 via precision=HIGHEST).
    """
    w_chunk_out = r_ref.shape[1]                       # tw * sw
    r = r_ref[...]
    for j in range(n_w):
        xj = x_ref[:, j * tw:(j + 1) * tw]
        if xj.dtype != compute_dtype:
            xj = xj.astype(compute_dtype)
        yj = jnp.dot(xj, r, preferred_element_type=jnp.float32,
                     precision=precision).astype(o_ref.dtype)
        for s in range(sh):
            base = s * w_out + j * w_chunk_out
            o_ref[:, base:base + w_chunk_out] = yj
    # TODO(synk): a genuine Inf/NaN in a valid input row is spread to the other columns
    # of its W-chunk by the 0-weight matmul terms (0*Inf = NaN); a strided-store /
    # gather replication path would avoid this hazard entirely.


def _pick_block_rows(rows, w_in, w_out, sh, itemsize, pack):
    """Rows per grid step: as large as a conservative VMEM budget allows (double-
    buffered in+out blocks + f32 temporaries), rounded to the dtype's sublane packing,
    keeping >= 2 grid steps when possible for pipelining / multi-core sharding."""
    per_row = 2 * itemsize * (w_in + sh * w_out) + 4 * (w_in + 2 * w_out)
    budget = 10 * 1024 * 1024
    tr = max(1, budget // per_row)
    if tr >= rows:
        if rows > 2 * pack:                            # keep >= 2 pipelined steps
            half = (rows + 1) // 2
            tr = ((half + pack - 1) // pack) * pack
        else:
            tr = rows                                  # block dim == full dim (legal)
    else:
        tr = max(pack, (tr // pack) * pack)            # multiple of sublane packing
    return int(tr)


def hw_upsample(x_nchw, *, size=None, scale_factor=None, mode="nearest",
                align_corners=False):
    """Pallas equivalent of hwUpsample.forward: nearest-neighbour NCHW upsampling by
    integer factors (sh, sw)."""
    if mode != "nearest":
        # TODO(synk): bilinear/bicubic need fractional-coordinate interpolation.
        raise NotImplementedError("only mode='nearest' is implemented")
    # align_corners only affects linear/cubic modes; it is ignored for 'nearest'.

    N, C, H, W = x_nchw.shape
    if size is not None:
        oh, ow = (size, size) if isinstance(size, int) else tuple(size)
        if oh % H or ow % W:
            raise NotImplementedError("only integer upscaling is supported")
        sh, sw = oh // H, ow // W
    else:
        if scale_factor is None:
            raise ValueError("either size or scale_factor must be given")
        sf = scale_factor if isinstance(scale_factor, (tuple, list)) else (scale_factor,) * 2
        shf, swf = float(sf[0]), float(sf[1])
        if shf != int(shf) or swf != int(swf) or shf < 1 or swf < 1:
            raise NotImplementedError("only positive integer scale factors are supported")
        sh, sw = int(shf), int(swf)

    dtype = x_nchw.dtype
    if not jnp.issubdtype(dtype, jnp.floating):
        # TODO(synk): integer dtypes need a matmul-free replication path to stay exact.
        raise NotImplementedError("only floating-point inputs are supported")
    if dtype == jnp.bfloat16:
        compute_dtype, precision = jnp.bfloat16, lax.Precision.DEFAULT   # native MXU path
    else:
        compute_dtype, precision = jnp.float32, lax.Precision.HIGHEST    # exact f32 copy

    rows = N * C * H
    w_out = W * sw
    itemsize = jnp.dtype(dtype).itemsize
    pack = max(8, 32 // itemsize)                      # sublane packing: 8 f32 / 16 bf16

    # Block-diagonal chunking of the column-replication over W: FLOPs and the resident
    # R become independent of W.  tw == W (single chunk) keeps block dims == full dims.
    tw = 128 if (W > 128 and W % 128 == 0) else W
    n_w = W // tw

    tr = _pick_block_rows(rows, W, w_out, sh, itemsize, pack)
    n_r = pl.cdiv(rows, tr)

    # Free row-major views: no transposes, fully contiguous HBM DMAs.
    x2 = x_nchw.reshape(rows, W)

    # Constant 0/1 column-replication block (identical for every W chunk), in the
    # matmul's compute dtype (bf16 stays bf16 -- no upcast of the data path).
    rep = (jnp.arange(tw)[:, None] == (jnp.arange(tw * sw)[None, :] // sw)).astype(compute_dtype)

    kernel = functools.partial(
        _nearest_upsample_kernel, sh=sh, tw=tw, n_w=n_w, w_out=w_out,
        compute_dtype=compute_dtype, precision=precision)

    # Explicit VMEM budget: double-buffered in/out blocks + R + f32 temporaries.
    c_item = jnp.dtype(compute_dtype).itemsize
    needed = (2 * tr * W * itemsize + 2 * tr * sh * w_out * itemsize
              + 2 * tw * tw * sw * c_item + 4 * tr * (tw + 2 * tw * sw))
    vmem_limit = int(min(48 << 20, max(32 << 20, 2 * needed)))

    cost = pl.CostEstimate(
        flops=int(2 * rows * W * tw * sw),
        transcendentals=0,
        bytes_accessed=int(itemsize * rows * (W + sh * w_out) + c_item * tw * tw * sw))

    out2 = pl.pallas_call(
        kernel,
        out_shape=jax.ShapeDtypeStruct((rows, sh * w_out), dtype),
        grid=(n_r,),
        in_specs=[
            pl.BlockSpec((tr, W), lambda i: (i, 0)),           # input row tile
            pl.BlockSpec((tw, tw * sw), lambda i: (0, 0)),     # constant R block (resident)
        ],
        out_specs=pl.BlockSpec((tr, sh * w_out), lambda i: (i, 0)),
        compiler_params=pltpu.CompilerParams(
            dimension_semantics=("parallel",),
            vmem_limit_bytes=vmem_limit),
        cost_estimate=cost,
    )(x2, rep)

    return out2.reshape(N, C, H * sh, W * sw)          # free reshape back to NCHW


if __name__ == "__main__":
    key = jax.random.PRNGKey(0)
    x = jax.random.normal(key, (2, 4, 16, 16), dtype=jnp.float32)  # NCHW

    # f32, scale_factor=2 (the way MedsegDiff uses hwUpsample).
    y = jax.block_until_ready(hw_upsample(x, scale_factor=2, mode="nearest"))
    ref = np.repeat(np.repeat(np.asarray(x), 2, axis=2), 2, axis=3)
    assert y.shape == (2, 4, 32, 32), y.shape
    np.testing.assert_array_equal(np.asarray(y), ref)

    # bf16 (no f32 upcast of the data path) with asymmetric integer scale via `size`.
    xb = x.astype(jnp.bfloat16)
    yb = jax.block_until_ready(hw_upsample(xb, size=(48, 32), mode="nearest"))
    refb = np.repeat(np.repeat(np.asarray(xb).astype(np.float32), 3, axis=2), 2, axis=3)
    assert yb.shape == (2, 4, 48, 32), yb.shape
    np.testing.assert_array_equal(np.asarray(yb).astype(np.float32), refb)

    print("KERNEL_OK")
</pallas_src>

<mosaic_0001>
module attributes {stable_mosaic.version = 11 : i64} {
  func.func @_nearest_upsample_kernel(%arg0: i32, %arg1: memref<64x16xf32, #tpu.memory_space<vmem>>, %arg2: memref<16x32xf32, #tpu.memory_space<vmem>>, %arg3: memref<64x64xf32, #tpu.memory_space<vmem>>) attributes {dimension_semantics = [#tpu.dimension_semantics<parallel>], iteration_bounds = array<i64: 2>, scalar_prefetch = 0 : i64, scratch_operands = 0 : i64, tpu.core_type = #tpu.core_type<tc>, window_params = [{transform_indices = @transform_0, window_bounds = array<i64: 64, 16>}, {pipeline_mode = #tpu.pipeline_mode<synchronous>, transform_indices = @transform_1, window_bounds = array<i64: 16, 32>}, {transform_indices = @transform_2, window_bounds = array<i64: 64, 64>}]} {
    %c0 = arith.constant 0 : index
    %c0_0 = arith.constant 0 : index
    %0 = vector.load %arg2[%c0, %c0_0] : memref<16x32xf32, #tpu.memory_space<vmem>>, vector<16x32xf32>
    %c0_1 = arith.constant 0 : index
    %c0_2 = arith.constant 0 : index
    %1 = vector.load %arg1[%c0_1, %c0_2] : memref<64x16xf32, #tpu.memory_space<vmem>>, vector<64x16xf32>
    %cst = arith.constant dense<0.000000e+00> : vector<64x32xf32>
    %2 = tpu.matmul %1, %0, %cst {dimension_numbers = #tpu.dot_dimension_numbers<[1], [0], [0], [1], [0, 0, 1, 1], [], []>, precision = #tpu.contract_precision<fp32>} : vector<64x16xf32>, vector<16x32xf32>, vector<64x32xf32> -> vector<64x32xf32>
    %c0_3 = arith.constant 0 : index
    %c0_4 = arith.constant 0 : index
    %3 = vector.load %arg3[%c0_3, %c0_4] : memref<64x64xf32, #tpu.memory_space<vmem>>, vector<64x32xf32>
    tpu.vector_store %arg3[%c0_3, %c0_4], %2 {strides = array<i32>} : memref<64x64xf32, #tpu.memory_space<vmem>>, vector<64x32xf32>,
    %c0_5 = arith.constant 0 : index
    %c32 = arith.constant 32 : index
    %4 = vector.load %arg3[%c0_5, %c32] : memref<64x64xf32, #tpu.memory_space<vmem>>, vector<64x32xf32>
    tpu.vector_store %arg3[%c0_5, %c32], %2 {strides = array<i32>} : memref<64x64xf32, #tpu.memory_space<vmem>>, vector<64x32xf32>,
    return
  }
  func.func @transform_0(%arg0: i32) -> (i32, i32) {
    %c0_i32 = arith.constant 0 : i32
    %c0_i32_0 = arith.constant 0 : i32
    return %arg0, %c0_i32 : i32, i32
  }
  func.func @transform_1(%arg0: i32) -> (i32, i32) {
    %c0_i32 = arith.constant 0 : i32
    %c0_i32_0 = arith.constant 0 : i32
    %c0_i32_1 = arith.constant 0 : i32
    return %c0_i32, %c0_i32_0 : i32, i32
  }
  func.func @transform_2(%arg0: i32) -> (i32, i32) {
    %c0_i32 = arith.constant 0 : i32
    %c0_i32_0 = arith.constant 0 : i32
    return %arg0, %c0_i32 : i32, i32
  }
}

</mosaic_0001>

<bundles_post_ra>
// kernel: tpu_custom_call.1
= control target key start
LH: loop header
LB: loop body
LE: loop exit
PB: predicated region body
PF: predicated region fallthrough
CT: control target
= control target key end

     0   :  { %s712_s9 = smov 0   ;;  %s873_s0 = inlined_call_operand.vmem [shape: f32[128,16], index: 0, kind: input, shape index: {}]   ;;  %s874_s1 = inlined_call_operand.vmem [shape: f32[16,32], index: 1, kind: input, shape index: {}]   ;;  %s875_s2 = inlined_call_operand.vmem [shape: f32[128,64], index: 2, kind: output, shape index: {}]  }
   0x1 LB: > { %s664_s10 = sadd.s32 4294967295, %s694_s9   ;;  %p668_p0 = scmp.ge.s32.totalorder %s694_s9, 1  ;;  %s694_s9 = sphi %s712_s9, %s12_s9  }
   0x2   : > { %p113_p1 = scmp.lt.s32.totalorder %s694_s9, 3 }
   0x4   : > { %p114_p2 = pnand %p668_p0, %p113_p1 }
   0x5   : > { %s669_s15 = sshll.u32 (!%p114_p2), %s664_s10, 3  ;;  %s696_s23 = smov (!%p114_p2), 32  }
   0x6   : > { %117 = sbr.rel (%p114_p2) target bundleno = 371 (0x173), region = 28  ;;  %p136_p3 = scmp.lt.s32.totalorder (!%p114_p2), %s669_s15, 15 }
   0xb   : > { %v148_v0 = vld [vmem:[%s874_s1 + $0x8] sm:$0xff]  ;;  %v147_v1 = vld [vmem:[%s874_s1] sm:$0xff]  ;;  %s877_s15 = smov (!%p136_p3, %s669_s15), 15  ;;  %vm157_vm0 = vcmask 130048   ;;  %vm558_vm1 = vcmask 261120   ;;  %vm599_vm2 = vcmask 523520  }
   0xc   : > { %v196_v2 = vand.u32 4294901760, %v148_v0  ;;  %v198_v3 = vand.u32 4294901760, %v147_v1  ;;  %s670_s16 = sshll.u32 %s877_s15, 3 }
   0xd   : > { %s734_s19 = scalar_lea.vmem %s873_s0, %s670_s16  ;;  %s822_s22 = scalar_lea.vmem %s875_s2, %s670_s16 }
   0xe   : > { %675 = vmatpush.msra.mxu2 %v196_v2  ;;  %v280_v4 = vsub.f32 %v148_v0, %v196_v2  ;;  %v286_v5 = vsub.f32 %v147_v1, %v198_v3  ;;  %197 = vmatpush.msra.mxu0 %v196_v2  ;;  %v153_v10 = vld [vmem:[%s734_s19 + $0x20] sm:$0xff]  ;;  %v154_v11 = vld [vmem:[%s734_s19 + $0x28] sm:$0xff]  ;;  %v155_v21 = vld [vmem:[%s734_s19 + $0x30] sm:$0xff] }
   0xf   : > { %v149_v12 = vld [vmem:[%s734_s19] sm:$0xff]  ;;  %v171_v13 = vsel %vm157_vm0, %v153_v10, 0  ;;  %v174_v14 = vsel %vm157_vm0, %v154_v11, 0  ;;  %v150_v16 = vld [vmem:[%s734_s19 + $0x8] sm:$0xff]  ;;  %v151_v24 = vld [vmem:[%s734_s19 + $0x10] sm:$0xff]  ;;  %v177_v29 = vsel %vm157_vm0, %v155_v21, 0 }
  0x10   : > { %v281_v6 = vand.u32 4294901760, %v280_v4  ;;  %676 = vmatpush.msra.mxu2 %v198_v3  ;;  %v287_v7 = vand.u32 4294901760, %v286_v5  ;;  %199 = vmatpush.msra.mxu0 %v198_v3  ;;  %v159_v15 = vsel %vm157_vm0, %v149_v12, 0  ;;  %v743_v19 = vand.u32 4294901760, %v171_v13  ;;  %v156_v41 = vld [vmem:[%s734_s19 + $0x38] sm:$0xff] }
  0x11   : > { %v745_v20 = vand.u32 4294901760, %v174_v14  ;;  %v748_v22 = vand.u32 4294901760, %v159_v15  ;;  %v162_v23 = vsel %vm157_vm0, %v150_v16, 0  ;;  %v165_v32 = vsel %vm157_vm0, %v151_v24, 0  ;;  %v152_v43 = vld [vmem:[%s734_s19 + $0x18] sm:$0xff] }
  0x12   : > { %340 = vmatpush.msrb.mxu2 %v280_v4  ;;  %v282_v8 = vsub.f32 %v280_v4, %v281_v6  ;;  %v288_v9 = vsub.f32 %v286_v5, %v287_v7  ;;  %469 = vmatpush.msrb.mxu0 %v281_v6  ;;  %v753_v25 = vsub.f32 %v171_v13, %v743_v19  ;;  %v758_v27 = vand.u32 4294901760, %v162_v23 }
  0x13   : > { %v756_v26 = vsub.f32 %v174_v14, %v745_v20  ;;  %v761_v28 = vsub.f32 %v159_v15, %v748_v22  ;;  %v774_v36 = vand.u32 4294901760, %v177_v29  ;;  %v216_v39 = vand.u32 4294901760, %v165_v32 }
  0x14   : > { %343 = vmatpush.msrb.mxu2 %v286_v5  ;;  %v283_v17 = vand.u32 4294901760, %v282_v8  ;;  %v289_v18 = vand.u32 4294901760, %v288_v9  ;;  %473 = vmatpush.msrb.mxu0 %v287_v7  ;;  %v234_v30 = vand.u32 4294901760, %v753_v25  ;;  %v209_v31 = vsub.f32 %v162_v23, %v758_v27 }
  0x15   : > { %v202_v33 = vand.u32 4294901760, %v761_v28  ;;  %v242_v35 = vand.u32 4294901760, %v756_v26  ;;  %v249_v45 = vsub.f32 %v177_v29, %v774_v36  ;;  %v180_v47 = vsel %vm157_vm0, %v156_v41, 0 }
  0x16   : > { %677 = vmatpush.msra.mxu3 %v283_v17  ;;  %284 = vmatpush.msra.mxu1 %v283_v17  ;;  %v235_v34 = vsub.f32 %v753_v25, %v234_v30  ;;  %v210_v38 = vand.u32 4294901760, %v209_v31  ;;  %v217_v48 = vsub.f32 %v165_v32, %v216_v39  ;;  %v168_v49 = vsel %vm157_vm0, %v152_v43, 0 }
  0x17   : > { %v203_v37 = vsub.f32 %v761_v28, %v202_v33  ;;  %v243_v44 = vsub.f32 %v756_v26, %v242_v35  ;;  %v250_v51 = vand.u32 4294901760, %v249_v45  ;;  %v256_v52 = vand.u32 4294901760, %v180_v47 }
  0x18   : > { %678 = vmatpush.msra.mxu3 %v289_v18  ;;  %290 = vmatpush.msra.mxu1 %v289_v18  ;;  %v236_v40 = vand.u32 4294901760, %v235_v34  ;;  %v211_v46 = vsub.f32 %v209_v31, %v210_v38  ;;  %v218_v54 = vand.u32 4294901760, %v217_v48  ;;  %v224_v55 = vand.u32 4294901760, %v168_v49 }
  0x19   : > { %308 = vmatmul.f32.vlgmr.msra.gmra.mxu3 %v743_v19  ;;  %292 = vmatmul.f32.vlgmr.msra.gmra.mxu1 %v748_v22  ;;  %v204_v42 = vand.u32 4294901760, %v203_v37  ;;  %v244_v50 = vand.u32 4294901760, %v243_v44  ;;  %v251_v56 = vsub.f32 %v249_v45, %v250_v51  ;;  %v257_v57 = vsub.f32 %v180_v47, %v256_v52 }
  0x1a   : > { %400 = vmatpush.msrb.mxu3 %v196_v2  ;;  %522 = vmatpush.msrb.mxu1 %v196_v2  ;;  %v212_v53 = vand.u32 4294901760, %v211_v46  ;;  %v219_v58 = vsub.f32 %v217_v48, %v218_v54  ;;  %v225_v59 = vsub.f32 %v168_v49, %v224_v55 }
  0x1b   : > { %237 = vmatmul.f32.vlgmr.msra.gmra.mxu2 %v236_v40  ;;  %205 = vmatmul.f32.vlgmr.msra.gmra.mxu0 %v204_v42  ;;  %v252_v60 = vand.u32 4294901760, %v251_v56  ;;  %v258_v61 = vand.u32 4294901760, %v257_v57 }
  0x1c   : > { %402 = vmatpush.msrb.mxu3 %v198_v3  ;;  %524 = vmatpush.msrb.mxu1 %v198_v3  ;;  %v220_v62 = vand.u32 4294901760, %v219_v58  ;;  %v226_v63 = vand.u32 4294901760, %v225_v59 }
  0x1d   : > { %v259_v0 = vsub.f32 %v257_v57, %v258_v61 }
  0x1e   : > { %v227_v1 = vsub.f32 %v225_v59, %v226_v63 }
  0x1f   : > { %v260_v2 = vand.u32 4294901760, %v259_v0 }
  0x20   : > { %v228_v3 = vand.u32 4294901760, %v227_v1 }
  0x21   : > { %312 = vmatmul.f32.gmra.mxu3 %v745_v20  ;;  %296 = vmatmul.f32.gmra.mxu1 %v758_v27 }
  0x23   : > { %245 = vmatmul.f32.gmra.mxu2 %v244_v50  ;;  %213 = vmatmul.f32.gmra.mxu0 %v212_v53 }
  0x29   : > { %316 = vmatmul.f32.gmra.mxu3 %v774_v36  ;;  %300 = vmatmul.f32.gmra.mxu1 %v216_v39 }
  0x2b   : > { %253 = vmatmul.f32.gmra.mxu2 %v252_v60  ;;  %221 = vmatmul.f32.gmra.mxu0 %v220_v62 }
  0x31   : > { %320 = vmatmul.f32.gmra.mxu3 %v256_v52  ;;  %304 = vmatmul.f32.gmra.mxu1 %v224_v55 }
  0x33   : > { %261 = vmatmul.f32.gmra.mxu2 %v260_v2  ;;  %229 = vmatmul.f32.gmra.mxu0 %v228_v3 }
  0x39   : > { %406 = vmatmul.f32.vlgmr.msrb.gmra.mxu3 %v202_v33  ;;  %526 = vmatmul.f32.vlgmr.msrb.gmra.mxu1 %v748_v22 }
  0x3b   : > { %346 = vmatmul.f32.vlgmr.msrb.gmra.mxu2 %v761_v28  ;;  %475 = vmatmul.f32.vlgmr.msrb.gmra.mxu0 %v748_v22 }
  0x41   : > { %412 = vmatmul.f32.gmra.mxu3 %v210_v38  ;;  %530 = vmatmul.f32.gmra.mxu1 %v758_v27 }
  0x43   : > { %351 = vmatmul.f32.gmra.mxu2 %v209_v31  ;;  %479 = vmatmul.f32.gmra.mxu0 %v758_v27 }
  0x49   : > { %418 = vmatmul.f32.gmra.mxu3 %v218_v54  ;;  %534 = vmatmul.f32.gmra.mxu1 %v216_v39 }
  0x4b   : > { %356 = vmatmul.f32.gmra.mxu2 %v217_v48  ;;  %483 = vmatmul.f32.gmra.mxu0 %v216_v39 }
  0x51   : > { %424 = vmatmul.f32.gmra.mxu3 %v226_v63  ;;  %538 = vmatmul.f32.gmra.mxu1 %v224_v55 }
  0x53   : > { %361 = vmatmul.f32.gmra.mxu2 %v225_v59  ;;  %487 = vmatmul.f32.gmra.mxu0 %v224_v55 }
  0x59   : > { %430 = vmatmul.f32.gmra.mxu3 %v234_v30  ;;  %542 = vmatmul.f32.gmra.mxu1 %v743_v19 }
  0x5b   : > { %366 = vmatmul.f32.gmra.mxu2 %v753_v25  ;;  %491 = vmatmul.f32.gmra.mxu0 %v743_v19 }
  0x61   : > { %436 = vmatmul.f32.gmra.mxu3 %v242_v35  ;;  %546 = vmatmul.f32.gmra.mxu1 %v745_v20 }
  0x63   : > { %371 = vmatmul.f32.gmra.mxu2 %v756_v26  ;;  %495 = vmatmul.f32.gmra.mxu0 %v745_v20 }
  0x69   : > { %442 = vmatmul.f32.gmra.mxu3 %v250_v51  ;;  %550 = vmatmul.f32.gmra.mxu1 %v774_v36 }
  0x6b   : > { %376 = vmatmul.f32.gmra.mxu2 %v249_v45  ;;  %499 = vmatmul.f32.gmra.mxu0 %v774_v36 }
  0x71   : > { %448 = vmatmul.f32.gmra.mxu3 %v258_v61  ;;  %554 = vmatmul.f32.gmra.mxu1 %v256_v52 }
  0x73   : > { %381 = vmatmul.f32.gmra.mxu2 %v257_v57  ;;  %503 = vmatmul.f32.gmra.mxu0 %v256_v52 }
  0x96   : > { %v293_v4 = vpop.f32.mrf.mxu1 }
  0x98   : > { %v206_v6 = vpop.f32.mrf.mxu0 }
  0x99   : > { %v294_v23 = vadd.f32 %v293_v4, %v206_v6 }
  0x9c   : > { %v309_v5 = vpop.f32.mrf.mxu3 }
  0x9e   : > { %v297_v7 = vpop.f32.mrf.mxu1  ;;  %v238_v8 = vpop.f32.mrf.mxu2 }
  0x9f   : > { %v310_v58 = vadd.f32 %v309_v5, %v238_v8 }
  0xa0   : > { %v214_v10 = vpop.f32.mrf.mxu0 }
  0xa1   : > { %v298_v31 = vadd.f32 %v297_v7, %v214_v10 }
  0xa4   : > { %v805_v9 = vpop.f32.mrf.mxu3 }
  0xa6   : > { %v301_v11 = vpop.f32.mrf.mxu1  ;;  %v807_v12 = vpop.f32.mrf.mxu2 }
  0xa7   : > { %v314_v2 = vadd.f32 %v805_v9, %v807_v12 }
  0xa8   : > { %v222_v14 = vpop.f32.mrf.mxu0 }
  0xa9   : > { %v302_v40 = vadd.f32 %v301_v11, %v222_v14 }
  0xac   : > { %v809_v13 = vpop.f32.mrf.mxu3 }
  0xae   : > { %v305_v15 = vpop.f32.mrf.mxu1  ;;  %v811_v16 = vpop.f32.mrf.mxu2 }
  0xaf   : > { %v318_v11 = vadd.f32 %v809_v13, %v811_v16 }
  0xb0   : > { %v230_v18 = vpop.f32.mrf.mxu0 }
  0xb1   : > { %v306_v49 = vadd.f32 %v305_v15, %v230_v18 }
  0xb4   : > { %v813_v17 = vpop.f32.mrf.mxu3 }
  0xb6   : > { %v527_v19 = vpop.f32.mrf.mxu1  ;;  %v815_v20 = vpop.f32.mrf.mxu2 }
  0xb8   : > { %v476_v22 = vpop.f32.mrf.mxu0 }
  0xbc   : > { %v407_v21 = vpop.f32.mrf.mxu3 }
  0xbe   : > { %v347_v24 = vpop.f32.mrf.mxu2  ;;  %v531_v25 = vpop.f32.mrf.mxu1 }
  0xbf   : > { %v348_v26 = vadd.f32 %v347_v24, %v294_v23 }
  0xc0   : > { %v480_v29 = vpop.f32.mrf.mxu0 }
  0xc1   : > { %v408_v27 = vadd.f32 %v407_v21, %v348_v26 }
  0xc3   : > { %v477_v30 = vadd.f32 %v476_v22, %v408_v27  ;;  %v322_v22 = vadd.f32 %v813_v17, %v815_v20 }
  0xc4   : > { %v413_v28 = vpop.f32.mrf.mxu3 }
  0xc5   : > { %v528_v32 = vadd.f32 %v527_v19, %v477_v30 }
  0xc6   : > { %v352_v33 = vpop.f32.mrf.mxu2  ;;  %v535_v35 = vpop.f32.mrf.mxu1 }
  0xc7   : > { %559 = vst.msk [vmem:[%s822_s22] sm:$0xff] %vm558_vm1, %v528_v32  ;;  %v353_v34 = vadd.f32 %v352_v33, %v298_v31  ;;  %575 = vrot.lane.b32.xlu0 %v528_v32, %s696_s23 }
  0xc8   : > { %v484_v38 = vpop.f32.mrf.mxu0 }
  0xc9   : > { %v414_v36 = vadd.f32 %v413_v28, %v353_v34 }
  0xcb   : > { %v481_v39 = vadd.f32 %v480_v29, %v414_v36 }
  0xcc   : > { %v419_v37 = vpop.f32.mrf.mxu3 }
  0xcd   : > { %v532_v41 = vadd.f32 %v531_v25, %v481_v39 }
  0xce   : > { %v357_v42 = vpop.f32.mrf.mxu2  ;;  %v539_v47 = vpop.f32.mrf.mxu1 }
  0xcf   : > { %560 = vst.msk [vmem:[%s822_s22 + $0x8] sm:$0xff] %vm558_vm1, %v532_v41  ;;  %v358_v43 = vadd.f32 %v357_v42, %v302_v40  ;;  %577 = vrot.lane.b32.xlu0 %v532_v41, %s696_s23 }
  0xd0   : > { %v488_v46 = vpop.f32.mrf.mxu0 }
  0xd1   : > { %v420_v44 = vadd.f32 %v419_v37, %v358_v43 }
  0xd3   : > { %v485_v48 = vadd.f32 %v484_v38, %v420_v44 }
  0xd4   : > { %v425_v45 = vpop.f32.mrf.mxu3 }
  0xd5   : > { %v536_v50 = vadd.f32 %v535_v35, %v485_v48 }
  0xd6   : > { %v362_v51 = vpop.f32.mrf.mxu2  ;;  %v543_v57 = vpop.f32.mrf.mxu1 }
  0xd7   : > { %561 = vst.msk [vmem:[%s822_s22 + $0x10] sm:$0xff] %vm558_vm1, %v536_v50  ;;  %v363_v52 = vadd.f32 %v362_v51, %v306_v49  ;;  %579 = vrot.lane.b32.xlu1 %v536_v50, %s696_s23 }
  0xd8   : > { %v492_v55 = vpop.f32.mrf.mxu0 }
  0xd9   : > { %v426_v53 = vadd.f32 %v425_v45, %v363_v52 }
  0xdb   : > { %v489_v56 = vadd.f32 %v488_v46, %v426_v53 }
  0xdc   : > { %v431_v54 = vpop.f32.mrf.mxu3 }
  0xdd   : > { %v540_v59 = vadd.f32 %v539_v47, %v489_v56 }
  0xde   : > { %v367_v60 = vpop.f32.mrf.mxu2  ;;  %v547_v6 = vpop.f32.mrf.mxu1 }
  0xdf   : > { %562 = vst.msk [vmem:[%s822_s22 + $0x18] sm:$0xff] %vm558_vm1, %v540_v59  ;;  %v368_v61 = vadd.f32 %v367_v60, %v310_v58  ;;  %581 = vrot.lane.b32.xlu1 %v540_v59, %s696_s23 }
  0xe0   : > { %v496_v1 = vpop.f32.mrf.mxu0 }
  0xe1   : > { %v432_v62 = vadd.f32 %v431_v54, %v368_v61 }
  0xe3   : > { %v493_v0 = vadd.f32 %v492_v55, %v432_v62 }
  0xe4   : > { %v437_v63 = vpop.f32.mrf.mxu3 }
  0xe5   : > { %v544_v3 = vadd.f32 %v543_v57, %v493_v0 }
  0xe6   : > { %v372_v4 = vpop.f32.mrf.mxu2  ;;  %v551_v12 = vpop.f32.mrf.mxu1 }
  0xe7   : > { %563 = vst.msk [vmem:[%s822_s22 + $0x20] sm:$0xff] %vm558_vm1, %v544_v3  ;;  %v373_v5 = vadd.f32 %v372_v4, %v314_v2  ;;  %583 = vrot.lane.b32.xlu2 %v544_v3, %s696_s23 }
  0xe8   : > { %v500_v18 = vpop.f32.mrf.mxu0 }
  0xe9   : > { %v438_v7 = vadd.f32 %v437_v63, %v373_v5 }
  0xeb   : > { %v497_v8 = vadd.f32 %v496_v1, %v438_v7 }
  0xec   : > { %v443_v10 = vpop.f32.mrf.mxu3 }
  0xed   : > { %v548_v14 = vadd.f32 %v547_v6, %v497_v8 }
  0xee   : > { %v377_v15 = vpop.f32.mrf.mxu2  ;;  %v555_v27 = vpop.f32.mrf.mxu1 }
  0xef   : > { %564 = vst.msk [vmem:[%s822_s22 + $0x28] sm:$0xff] %vm558_vm1, %v548_v14  ;;  %v378_v9 = vadd.f32 %v377_v15, %v318_v11  ;;  %585 = vrot.lane.b32.xlu2 %v548_v14, %s696_s23 }
  0xf0   : > { %v504_v16 = vpop.f32.mrf.mxu0 }
  0xf1   : > { %v444_v19 = vadd.f32 %v443_v10, %v378_v9 }
  0xf3   : > { %v501_v21 = vadd.f32 %v500_v18, %v444_v19 }
  0xf4   : > { %v449_v25 = vpop.f32.mrf.mxu3 }
  0xf5   : > { %v552_v23 = vadd.f32 %v551_v12, %v501_v21 }
  0xf6   : > { %v382_v24 = vpop.f32.mrf.mxu2 }
  0xf7   : > { %565 = vst.msk [vmem:[%s822_s22 + $0x30] sm:$0xff] %vm558_vm1, %v552_v23  ;;  %v383_v13 = vadd.f32 %v382_v24, %v322_v22  ;;  %587 = vrot.lane.b32.xlu0 %v552_v23, %s696_s23 }
  0xf9   : > { %v450_v26 = vadd.f32 %v449_v25, %v383_v13 }
  0xfb   : > { %v505_v28 = vadd.f32 %v504_v16, %v450_v26 }
  0xfd   : > { %v556_v29 = vadd.f32 %v555_v27, %v505_v28 }
  0xff   : > { %566 = vst.msk [vmem:[%s822_s22 + $0x38] sm:$0xff] %vm558_vm1, %v556_v29  ;;  %589 = vrot.lane.b32.xlu1 %v556_v29, %s696_s23 }
 0x139   : > { %v576_v17 = vpop.permute.xlu0 %575 }
 0x13a   : > { %600 = vst.msk [vmem:[%s822_s22] sm:$0xff] %vm599_vm2, %v576_v17 }
 0x141   : > { %v584_v20 = vpop.permute.xlu2 %583  ;;  %v578_v30 = vpop.permute.xlu0 %577 }
 0x142   : > { %604 = vst.msk [vmem:[%s822_s22 + $0x20] sm:$0xff] %vm599_vm2, %v584_v20 }
 0x143   : > { %601 = vst.msk [vmem:[%s822_s22 + $0x8] sm:$0xff] %vm599_vm2, %v578_v30 }
 0x149   : > { %v586_v31 = vpop.permute.xlu2 %585  ;;  %v580_v32 = vpop.permute.xlu1 %579 }
 0x14a   : > { %605 = vst.msk [vmem:[%s822_s22 + $0x28] sm:$0xff] %vm599_vm2, %v586_v31 }
 0x14b   : > { %602 = vst.msk [vmem:[%s822_s22 + $0x10] sm:$0xff] %vm599_vm2, %v580_v32 }
 0x151   : > { %v582_v33 = vpop.permute.xlu1 %581 }
 0x152   : > { %603 = vst.msk [vmem:[%s822_s22 + $0x18] sm:$0xff] %vm599_vm2, %v582_v33 }
 0x169   : > { %v588_v34 = vpop.permute.xlu0 %587 }
 0x16a   : > { %606 = vst.msk [vmem:[%s822_s22 + $0x30] sm:$0xff] %vm599_vm2, %v588_v34 }
 0x171   : > { %v590_v35 = vpop.permute.xlu1 %589 }
 0x172   : > { %607 = vst.msk [vmem:[%s822_s22 + $0x38] sm:$0xff] %vm599_vm2, %v590_v35 }
 0x173 PF: > { %s12_s9 = sadd.s32 1, %s694_s9  }
 0x174   : > { %p9_p4 = scmp.ge.s32.totalorder %s12_s9, 4  }
 0x176   :  { %11 = sbr.rel (!%p9_p4) target bundleno = 1 (0x1), region = 58 }

</bundles_post_ra>
